<compile_context>
chip_gen: v7x
topology: tpu7x:2x2x1
jax: 0.10.0
libtpu: 0.0.40
codegen_flags: <defaults>
</compile_context>

<pallas_src>
import functools

import jax
import jax.numpy as jnp
from jax import lax
from jax.experimental import pallas as pl
from jax.experimental.pallas import tpu as pltpu


def _corr_norm_kernel(ok_ref, fk_ref, corr_ref, out_ref, ak_scr,
                      *, B, H, W, D, K, g):
    """One grid step = one tile of `thw` rows of corr2d (HW, XYZ).

    ok_ref  : (B, XYZ)      resident (same block every step), native dtype
    fk_ref  : (B, thw, D)   per-tile rows of fk, native dtype
    corr_ref: (thw, XYZ)    corr2d tile (lane-dense output)
    out_ref : (B*H, K)      normalized output, written on the last step only
    ak_scr  : (B*H, K) f32  VMEM scratch holding ak = corr.sum over W
    """
    i = pl.program_id(0)
    n = pl.num_programs(0)
    thw = corr_ref.shape[0]

    ok_f32 = ok_ref[...].astype(jnp.float32)                     # (B, XYZ)
    fk_f32 = fk_ref[...].astype(jnp.float32)                     # (B, thw, D)

    # ---- corr tile: corr[hw, xyz] = sum_b (sum_d fk[b,hw,d]) * ok[b,xyz] ----------
    if B <= 8:
        # Tiny batch: an unrolled VPU outer product; an MXU matmul here would only
        # have a contraction dim of B and the kernel is HBM-writeback bound anyway.
        acc = None
        for b in range(B):
            col = jnp.sum(fk_f32[b], axis=-1, keepdims=True)     # (thw, 1)  d-sum
            row = ok_f32[b:b + 1, :]                             # (1, XYZ)
            term = col * row                                     # (thw, XYZ)
            acc = term if acc is None else acc + term
    else:
        # Larger batch: contract over B on the MXU after the d-sum.
        fsum = jnp.sum(fk_f32, axis=-1)                          # (B, thw)
        acc = lax.dot_general(fsum, ok_f32,
                              dimension_numbers=(((0,), (0,)), ((), ())),
                              preferred_element_type=jnp.float32)  # (thw, XYZ)

    corr_ref[...] = acc.astype(corr_ref.dtype)

    # ---- ak contribution: W-group sums of the flat (B*H*W, K) view of corr --------
    # Tile rows cover flat rows [i*thw*B, (i+1)*thw*B), i.e. complete W-groups
    # (tile selection guarantees thw*B % W == 0), so each step finishes
    # g = thw*B/W rows of ak and writes them to disjoint scratch rows.
    # Grouping is done with an iota-built 0/1 matrix + MXU matmul (no in-kernel
    # reshapes of big values -> robust lowering).
    j_ids = lax.broadcasted_iota(jnp.int32, (g, thw), 0)
    hw_ids = lax.broadcasted_iota(jnp.int32, (g, thw), 1)
    if W % B == 0:
        # All B lane-groups of a corr row land in the same W-group.
        qsum = acc[:, 0:K]
        for q in range(1, B):
            qsum = qsum + acc[:, q * K:(q + 1) * K]              # (thw, K)
        flat = hw_ids * B
        gmat = ((flat >= j_ids * W) & (flat < j_ids * W + W)).astype(jnp.float32)
        ak_part = jnp.dot(gmat, qsum, preferred_element_type=jnp.float32)
    else:
        ak_part = jnp.zeros((g, K), jnp.float32)
        for q in range(B):
            flat = hw_ids * B + q
            gmat = ((flat >= j_ids * W) & (flat < j_ids * W + W)).astype(jnp.float32)
            ak_part = ak_part + jnp.dot(gmat, acc[:, q * K:(q + 1) * K],
                                        preferred_element_type=jnp.float32)

    ak_scr[pl.ds(pl.multiple_of(i * g, g), g), :] = ak_part

    # ---- final step: global-mean mask + per-(b, k) min/max normalization ----------
    @pl.when(i == n - 1)
    def _():
        ak = ak_scr[...]                                         # (B*H, K) f32
        avg = jnp.mean(ak)
        masked = jnp.where(ak > avg, ak, jnp.zeros_like(ak))
        for b in range(B):
            blk = masked[b * H:(b + 1) * H, :]                   # (H, K)
            shifted = blk - jnp.min(blk, axis=0, keepdims=True)
            mx = jnp.max(shifted, axis=0, keepdims=True)
            # 0 * inf -> nan when a whole column is masked out, matching PyTorch's 0/0.
            out_ref[pl.ds(b * H, H), :] = (
                shifted * pl.reciprocal(mx, approx=False)).astype(out_ref.dtype)


def _pick_hw_tile(HW, B, W, XYZ, tile_budget_bytes=4 * 1024 * 1024):
    """Largest hw-tile that (a) divides HW, (b) keeps thw*B a multiple of W so the
    W-groups of the flat (B*H*W, K) view never straddle a tile, (c) satisfies the
    (8, 128) sublane constraint, and (d) keeps the f32 corr tile under budget
    (double-buffered it stays well inside v5e/v6e/v7x VMEM)."""
    cands = [t for t in range(1, HW + 1)
             if HW % t == 0 and (t * B) % W == 0 and (t % 8 == 0 or t == HW)]
    fitting = [t for t in cands if t * XYZ * 4 <= tile_budget_bytes]
    return max(fitting) if fitting else min(cands)


def correlation_block(ok, fk):
    """Pallas implementation of CorrelationBlock.forward. Returns (corr, avg_ak_hat)."""
    B, H, W, D = fk.shape
    Bo, X, Y, Z = ok.shape
    assert Bo == B
    HW, XYZ = H * W, X * Y * Z
    assert XYZ % B == 0, "PyTorch reshape (B, H, W, -1) requires X*Y*Z divisible by B"
    K = XYZ // B
    out_dtype = jnp.result_type(ok.dtype, fk.dtype)

    # Flat (free) reshapes only; inputs stay in their native dtype (no pre-upcast).
    ok2 = ok.reshape(B, XYZ)
    fk3 = fk.reshape(B, HW, D)

    thw = _pick_hw_tile(HW, B, W, XYZ)
    g = thw * B // W          # finished ak rows produced per grid step
    nsteps = HW // thw

    kernel = functools.partial(_corr_norm_kernel, B=B, H=H, W=W, D=D, K=K, g=g)

    flops = (2 * B * HW * XYZ                 # corr outer-product / matmul MACs
             + B * HW * D                     # d-sum
             + 2 * nsteps * g * thw * K       # ak grouping matmul
             + 6 * B * H * K)                 # norm epilogue
    bytes_accessed = (ok2.size * ok2.dtype.itemsize
                      + fk3.size * fk3.dtype.itemsize
                      + HW * XYZ * jnp.dtype(out_dtype).itemsize
                      + B * H * K * jnp.dtype(out_dtype).itemsize)

    corr2d, out2 = pl.pallas_call(
        kernel,
        out_shape=(jax.ShapeDtypeStruct((HW, XYZ), out_dtype),
                   jax.ShapeDtypeStruct((B * H, K), out_dtype)),
        grid=(nsteps,),
        in_specs=[
            pl.BlockSpec((B, XYZ), lambda i: (0, 0)),        # ok: resident across steps
            pl.BlockSpec((B, thw, D), lambda i: (0, i, 0)),  # fk: per-tile rows
        ],
        out_specs=(
            pl.BlockSpec((thw, XYZ), lambda i: (i, 0)),      # corr2d tile (lane-dense)
            pl.BlockSpec((B * H, K), lambda i: (0, 0)),      # norm output (last step)
        ),
        scratch_shapes=[pltpu.VMEM((B * H, K), jnp.float32)],
        compiler_params=pltpu.CompilerParams(
            # single axis carries the streamed ak reduction + final norm -> sequential
            dimension_semantics=("arbitrary",),
            vmem_limit_bytes=48 * 1024 * 1024,               # fits v5e/v6e/v7x
        ),
        cost_estimate=pl.CostEstimate(flops=flops, transcendentals=B * K,
                                      bytes_accessed=bytes_accessed),
    )(ok2, fk3)

    # exact PyTorch `.reshape((B, H, W, -1))` -- pure flat reshapes (free in XLA)
    corr = corr2d.reshape(B, H, W, K)
    avg_ak_hat = out2.reshape(B, H, K)
    return corr, avg_ak_hat


def correlation_block_ref(ok, fk):
    """Pure-JAX reference mirroring the PyTorch code line by line."""
    B, H, W, _ = fk.shape
    corr = jnp.einsum('bxyz,bhwd->hwxyz', ok, fk).reshape(B, H, W, -1)
    ak = jnp.sum(corr, axis=2)
    avg = jnp.mean(ak)
    masked = jnp.where(ak > avg, ak, 0.0)
    masked = masked - jnp.min(masked, axis=1, keepdims=True)
    masked = masked / jnp.max(masked, axis=1, keepdims=True)
    return corr, masked


if __name__ == "__main__":
    # Small shapes consistent with the forward: ok (B,X,Y,Z), fk (B,H,W,D).
    # X*Y*Z = 256 is divisible by B = 2, so the PyTorch reshape is valid (K = 128).
    key = jax.random.PRNGKey(0)
    k_ok, k_fk = jax.random.split(key)
    B, H, W, D = 2, 8, 8, 4
    ok = jax.random.normal(k_ok, (B, H, W, D), dtype=jnp.float32)
    fk = jax.random.normal(k_fk, (B, H, W, D), dtype=jnp.float32)

    corr, avg_ak_hat = jax.block_until_ready(correlation_block(ok, fk))

    corr_ref, avg_ref = correlation_block_ref(ok, fk)
    K = (H * W * D) // B
    assert corr.shape == (B, H, W, K)
    assert avg_ak_hat.shape == (B, H, K)
    assert jnp.allclose(corr, corr_ref, rtol=1e-4, atol=1e-4)
    # division by a per-column max of 0 yields nan in PyTorch too; treat nan as equal
    assert bool(jnp.allclose(avg_ak_hat, avg_ref, rtol=1e-4, atol=1e-4, equal_nan=True))

    print("KERNEL_OK")
</pallas_src>

<mosaic_0001>
module attributes {stable_mosaic.version = 11 : i64} {
  func.func @_corr_norm_kernel(%arg0: i32, %arg1: memref<2x256xf32, #tpu.memory_space<vmem>>, %arg2: memref<2x64x4xf32, #tpu.memory_space<vmem>>, %arg3: memref<64x256xf32, #tpu.memory_space<vmem>>, %arg4: memref<16x128xf32, #tpu.memory_space<vmem>>, %arg5: memref<16x128xf32, #tpu.memory_space<vmem>>) attributes {dimension_semantics = [#tpu.dimension_semantics<arbitrary>], iteration_bounds = array<i64: 1>, scalar_prefetch = 0 : i64, scratch_operands = 1 : i64, tpu.core_type = #tpu.core_type<tc>, window_params = [{pipeline_mode = #tpu.pipeline_mode<synchronous>, transform_indices = @transform_0, window_bounds = array<i64: 2, 256>}, {transform_indices = @transform_1, window_bounds = array<i64: 2, 64, 4>}, {transform_indices = @transform_2, window_bounds = array<i64: 64, 256>}, {pipeline_mode = #tpu.pipeline_mode<synchronous>, transform_indices = @transform_3, window_bounds = array<i64: 16, 128>}]} {
    %c0 = arith.constant 0 : index
    %c0_0 = arith.constant 0 : index
    %0 = vector.load %arg1[%c0, %c0_0] : memref<2x256xf32, #tpu.memory_space<vmem>>, vector<2x256xf32>
    %c0_1 = arith.constant 0 : index
    %c0_2 = arith.constant 0 : index
    %c0_3 = arith.constant 0 : index
    %1 = vector.load %arg2[%c0_1, %c0_2, %c0_3] : memref<2x64x4xf32, #tpu.memory_space<vmem>>, vector<2x64x4xf32>
    %2 = vector.extract_strided_slice %1 {offsets = [0, 0, 0], sizes = [1, 64, 4], strides = [1, 1, 1]} : vector<2x64x4xf32> to vector<1x64x4xf32>
    %3 = vector.shape_cast %2 : vector<1x64x4xf32> to vector<64x4xf32>
    %cst = arith.constant dense<0.000000e+00> : vector<64xf32>
    %4 = vector.multi_reduction <add>, %3, %cst [1] : vector<64x4xf32> to vector<64xf32>
    %5 = vector.shape_cast %4 : vector<64xf32> to vector<64x1xf32>
    %6 = vector.extract_strided_slice %0 {offsets = [0, 0], sizes = [1, 256], strides = [1, 1]} : vector<2x256xf32> to vector<1x256xf32>
    %7 = vector.broadcast %5 : vector<64x1xf32> to vector<64x256xf32>
    %8 = vector.broadcast %6 : vector<1x256xf32> to vector<64x256xf32>
    %9 = arith.mulf %7, %8 : vector<64x256xf32>
    %10 = vector.extract_strided_slice %1 {offsets = [1, 0, 0], sizes = [1, 64, 4], strides = [1, 1, 1]} : vector<2x64x4xf32> to vector<1x64x4xf32>
    %11 = vector.shape_cast %10 : vector<1x64x4xf32> to vector<64x4xf32>
    %cst_4 = arith.constant dense<0.000000e+00> : vector<64xf32>
    %12 = vector.multi_reduction <add>, %11, %cst_4 [1] : vector<64x4xf32> to vector<64xf32>
    %13 = vector.shape_cast %12 : vector<64xf32> to vector<64x1xf32>
    %14 = vector.extract_strided_slice %0 {offsets = [1, 0], sizes = [1, 256], strides = [1, 1]} : vector<2x256xf32> to vector<1x256xf32>
    %15 = vector.broadcast %13 : vector<64x1xf32> to vector<64x256xf32>
    %16 = vector.broadcast %14 : vector<1x256xf32> to vector<64x256xf32>
    %17 = arith.mulf %15, %16 : vector<64x256xf32>
    %18 = arith.addf %9, %17 : vector<64x256xf32>
    %c0_5 = arith.constant 0 : index
    %c0_6 = arith.constant 0 : index
    %19 = vector.load %arg3[%c0_5, %c0_6] : memref<64x256xf32, #tpu.memory_space<vmem>>, vector<64x256xf32>
    tpu.vector_store %arg3[%c0_5, %c0_6], %18 {strides = array<i32>} : memref<64x256xf32, #tpu.memory_space<vmem>>, vector<64x256xf32>,
    %20 = tpu.iota {dimensions = array<i32: 0>} : vector<16x64xi32>
    %21 = tpu.iota {dimensions = array<i32: 1>} : vector<16x64xi32>
    %22 = vector.extract_strided_slice %18 {offsets = [0, 0], sizes = [64, 128], strides = [1, 1]} : vector<64x256xf32> to vector<64x128xf32>
    %23 = vector.extract_strided_slice %18 {offsets = [0, 128], sizes = [64, 128], strides = [1, 1]} : vector<64x256xf32> to vector<64x128xf32>
    %24 = arith.addf %22, %23 : vector<64x128xf32>
    %c2_i32 = arith.constant 2 : i32
    %25 = vector.broadcast %c2_i32 : i32 to vector<16x64xi32>
    %26 = arith.muli %21, %25 : vector<16x64xi32>
    %c8_i32 = arith.constant 8 : i32
    %27 = vector.broadcast %c8_i32 : i32 to vector<16x64xi32>
    %28 = arith.muli %20, %27 : vector<16x64xi32>
    %29 = arith.cmpi sge, %26, %28 : vector<16x64xi32>
    %c8_i32_7 = arith.constant 8 : i32
    %30 = vector.broadcast %c8_i32_7 : i32 to vector<16x64xi32>
    %31 = arith.muli %20, %30 : vector<16x64xi32>
    %c8_i32_8 = arith.constant 8 : i32
    %32 = vector.broadcast %c8_i32_8 : i32 to vector<16x64xi32>
    %33 = arith.addi %31, %32 : vector<16x64xi32>
    %34 = arith.cmpi slt, %26, %33 : vector<16x64xi32>
    %35 = arith.andi %29, %34 : vector<16x64xi1>
    %36 = arith.extui %35 : vector<16x64xi1> to vector<16x64xi32>
    %37 = arith.sitofp %36 : vector<16x64xi32> to vector<16x64xf32>
    %cst_9 = arith.constant dense<0.000000e+00> : vector<16x128xf32>
    %38 = tpu.matmul %37, %24, %cst_9 {dimension_numbers = #tpu.dot_dimension_numbers<[1], [0], [0], [1], [0, 0, 1, 1], [], []>} : vector<16x64xf32>, vector<64x128xf32>, vector<16x128xf32> -> vector<16x128xf32>
    %c16_i32 = arith.constant 16 : i32
    %39 = arith.muli %arg0, %c16_i32 : i32
    %40 = tpu.assume_multiple %39, 16 : i32
    %41 = arith.index_cast %40 : i32 to index
    %c0_10 = arith.constant 0 : index
    %42 = vector.load %arg5[%41, %c0_10] : memref<16x128xf32, #tpu.memory_space<vmem>>, vector<16x128xf32>
    tpu.vector_store %arg5[%41, %c0_10], %38 {strides = array<i32>} : memref<16x128xf32, #tpu.memory_space<vmem>>, vector<16x128xf32>,
    %c0_i32 = arith.constant 0 : i32
    %43 = arith.cmpi eq, %arg0, %c0_i32 : i32
    %44 = arith.extui %43 : i1 to i32
    %c0_i32_11 = arith.constant 0 : i32
    %45 = arith.cmpi ne, %44, %c0_i32_11 : i32
    scf.if %45 {
      %c0_12 = arith.constant 0 : index
      %c0_13 = arith.constant 0 : index
      %46 = vector.load %arg5[%c0_12, %c0_13] : memref<16x128xf32, #tpu.memory_space<vmem>>, vector<16x128xf32>
      %47 = vector.shape_cast %46 : vector<16x128xf32> to vector<1x16x128xf32>
      %cst_14 = arith.constant dense<0.000000e+00> : vector<1xf32>
      %48 = vector.multi_reduction <add>, %47, %cst_14 [1, 2] : vector<1x16x128xf32> to vector<1xf32>
      %49 = vector.shape_cast %48 : vector<1xf32> to vector<1x1x1xf32>
      %50 = vector.extract %49[0, 0, 0] : f32 from vector<1x1x1xf32>
      %cst_15 = arith.constant 2.048000e+03 : f32
      %51 = arith.divf %50, %cst_15 : f32
      %52 = vector.broadcast %51 : f32 to vector<16x128xf32>
      %53 = arith.cmpf ogt, %46, %52 : vector<16x128xf32>
      %cst_16 = arith.constant 0.000000e+00 : f32
      %54 = vector.broadcast %cst_16 : f32 to vector<16x128xf32>
      %55 = arith.select %53, %46, %54 : vector<16x128xi1>, vector<16x128xf32>
      %56 = vector.extract_strided_slice %55 {offsets = [0, 0], sizes = [8, 128], strides = [1, 1]} : vector<16x128xf32> to vector<8x128xf32>
      %cst_17 = arith.constant dense<0x7F800000> : vector<128xf32>
      %57 = vector.multi_reduction <minimumf>, %56, %cst_17 [0] : vector<8x128xf32> to vector<128xf32>
      %58 = vector.shape_cast %57 : vector<128xf32> to vector<1x128xf32>
      %59 = vector.broadcast %58 : vector<1x128xf32> to vector<8x128xf32>
      %60 = arith.subf %56, %59 : vector<8x128xf32>
      %cst_18 = arith.constant dense<0xFF800000> : vector<128xf32>
      %61 = vector.multi_reduction <maximumf>, %60, %cst_18 [0] : vector<8x128xf32> to vector<128xf32>
      %62 = vector.shape_cast %61 : vector<128xf32> to vector<1x128xf32>
      %63 = tpu.reciprocal %62 : vector<1x128xf32> -> vector<1x128xf32>
      %64 = vector.broadcast %63 : vector<1x128xf32> to vector<8x128xf32>
      %65 = arith.mulf %60, %64 : vector<8x128xf32>
      %c0_19 = arith.constant 0 : index
      %c0_20 = arith.constant 0 : index
      %66 = vector.load %arg4[%c0_19, %c0_20] : memref<16x128xf32, #tpu.memory_space<vmem>>, vector<8x128xf32>
      tpu.vector_store %arg4[%c0_19, %c0_20], %65 {strides = array<i32>} : memref<16x128xf32, #tpu.memory_space<vmem>>, vector<8x128xf32>,
      %67 = vector.extract_strided_slice %55 {offsets = [8, 0], sizes = [8, 128], strides = [1, 1]} : vector<16x128xf32> to vector<8x128xf32>
      %cst_21 = arith.constant dense<0x7F800000> : vector<128xf32>
      %68 = vector.multi_reduction <minimumf>, %67, %cst_21 [0] : vector<8x128xf32> to vector<128xf32>
      %69 = vector.shape_cast %68 : vector<128xf32> to vector<1x128xf32>
      %70 = vector.broadcast %69 : vector<1x128xf32> to vector<8x128xf32>
      %71 = arith.subf %67, %70 : vector<8x128xf32>
      %cst_22 = arith.constant dense<0xFF800000> : vector<128xf32>
      %72 = vector.multi_reduction <maximumf>, %71, %cst_22 [0] : vector<8x128xf32> to vector<128xf32>
      %73 = vector.shape_cast %72 : vector<128xf32> to vector<1x128xf32>
      %74 = tpu.reciprocal %73 : vector<1x128xf32> -> vector<1x128xf32>
      %75 = vector.broadcast %74 : vector<1x128xf32> to vector<8x128xf32>
      %76 = arith.mulf %71, %75 : vector<8x128xf32>
      %c8 = arith.constant 8 : index
      %c0_23 = arith.constant 0 : index
      %77 = vector.load %arg4[%c8, %c0_23] : memref<16x128xf32, #tpu.memory_space<vmem>>, vector<8x128xf32>
      tpu.vector_store %arg4[%c8, %c0_23], %76 {strides = array<i32>} : memref<16x128xf32, #tpu.memory_space<vmem>>, vector<8x128xf32>,
    } else {
    }
    return
  }
  func.func @transform_0(%arg0: i32) -> (i32, i32) {
    %c0_i32 = arith.constant 0 : i32
    %c0_i32_0 = arith.constant 0 : i32
    %c0_i32_1 = arith.constant 0 : i32
    return %c0_i32, %c0_i32_0 : i32, i32
  }
  func.func @transform_1(%arg0: i32) -> (i32, i32, i32) {
    %c0_i32 = arith.constant 0 : i32
    %c0_i32_0 = arith.constant 0 : i32
    %c0_i32_1 = arith.constant 0 : i32
    return %c0_i32, %arg0, %c0_i32_0 : i32, i32, i32
  }
  func.func @transform_2(%arg0: i32) -> (i32, i32) {
    %c0_i32 = arith.constant 0 : i32
    %c0_i32_0 = arith.constant 0 : i32
    return %arg0, %c0_i32 : i32, i32
  }
  func.func @transform_3(%arg0: i32) -> (i32, i32) {
    %c0_i32 = arith.constant 0 : i32
    %c0_i32_0 = arith.constant 0 : i32
    %c0_i32_1 = arith.constant 0 : i32
    return %c0_i32, %c0_i32_0 : i32, i32
  }
}

</mosaic_0001>

<bundles_post_ra>
// kernel: tpu_custom_call.1
= control target key start
LH: loop header
LB: loop body
LE: loop exit
PB: predicated region body
PF: predicated region fallthrough
CT: control target
= control target key end

     0   :  { %9 = vsyncpa [#allocation4], 0  ;;  %vm32_vm0 = vcmask 31744   ;;  %s657_s0 = inlined_call_operand.vmem [shape: f32[2,256], index: 0, kind: input, shape index: {}]   ;;  %s658_s1 = inlined_call_operand.vmem [shape: f32[2,64,4], index: 1, kind: input, shape index: {}]   ;;  %s659_s2 = inlined_call_operand.hbm [shape: f32[64,256], index: 2, kind: output, shape index: {0}]   ;;  %s660_s3 = inlined_call_operand.hbm [shape: f32[16,128], index: 3, kind: output, shape index: {1}]  }
   0x1   :  { %v24_v0 = vld [vmem:[%s658_s1 + $0x40] sm:$0xff]  ;;  %v25_v2 = vld [vmem:[%s658_s1 + $0x48] sm:$0xff]  ;;  %v19_v8 = vld [vmem:[%s658_s1 + $0x18] sm:$0xff] }
   0x2   :  { %v16_v1 = vld [vmem:[%s658_s1] sm:$0xff]  ;;  %v92_v3 = vsel %vm32_vm0, %v24_v0, 0.0  ;;  %v17_v5 = vld [vmem:[%s658_s1 + $0x8] sm:$0xff]  ;;  %v95_v6 = vsel %vm32_vm0, %v25_v2, 0.0  ;;  %v18_v9 = vld [vmem:[%s658_s1 + $0x10] sm:$0xff] }
   0x3   :  { %v33_v4 = vsel %vm32_vm0, %v16_v1, 0.0  ;;  %93 = vadd.xlane.f32.xlu1 %v92_v3  ;;  %v36_v7 = vsel %vm32_vm0, %v17_v5, 0.0 }
   0x4   :  { %34 = vadd.xlane.f32.xlu0 %v33_v4 }
   0x7   :  { %96 = vadd.xlane.f32.xlu1 %v95_v6 }
   0x8   :  { %37 = vadd.xlane.f32.xlu0 %v36_v7 }
   0x9   :  { %10 = vsyncpa [#allocation6], 0  ;;  %v42_v10 = vsel %vm32_vm0, %v19_v8, 0.0  ;;  %v39_v11 = vsel %vm32_vm0, %v18_v9, 0.0  ;;  %v27_v12 = vld [vmem:[%s658_s1 + $0x58] sm:$0xff]  ;;  %v26_v13 = vld [vmem:[%s658_s1 + $0x50] sm:$0xff]  ;;  %v58_v32 = vlaneseq }
   0xa   :  { %v101_v14 = vsel %vm32_vm0, %v27_v12, 0.0  ;;  %v98_v15 = vsel %vm32_vm0, %v26_v13, 0.0  ;;  %v21_v16 = vld [vmem:[%s658_s1 + $0x28] sm:$0xff]  ;;  %v20_v17 = vld [vmem:[%s658_s1 + $0x20] sm:$0xff]  ;;  %v23_v24 = vld [vmem:[%s658_s1 + $0x38] sm:$0xff]  ;;  %vm210_vm6 = vcmask 523264  }
   0xb   :  { %43 = vadd.xlane.f32.xlu1 %v42_v10  ;;  %v48_v18 = vsel %vm32_vm0, %v21_v16, 0.0  ;;  %v45_v19 = vsel %vm32_vm0, %v20_v17, 0.0  ;;  %v29_v20 = vld [vmem:[%s658_s1 + $0x68] sm:$0xff]  ;;  %v28_v21 = vld [vmem:[%s658_s1 + $0x60] sm:$0xff]  ;;  %v22_v25 = vld [vmem:[%s658_s1 + $0x30] sm:$0xff]  ;;  %v54_v26 = vsel %vm32_vm0, %v23_v24, 0.0 }
   0xc   :  { %40 = vadd.xlane.f32.xlu0 %v39_v11  ;;  %v107_v22 = vsel %vm32_vm0, %v29_v20, 0.0  ;;  %v104_v23 = vsel %vm32_vm0, %v28_v21, 0.0  ;;  %v51_v27 = vsel %vm32_vm0, %v22_v25, 0.0  ;;  %v31_v28 = vld [vmem:[%s658_s1 + $0x78] sm:$0xff]  ;;  %v30_v29 = vld [vmem:[%s658_s1 + $0x70] sm:$0xff]  ;;  %v59_v33 = vshrl.u32 %v58_v32, 7 }
   0xd   :  { %v113_v30 = vsel %vm32_vm0, %v31_v28, 0.0  ;;  %v110_v31 = vsel %vm32_vm0, %v30_v29, 0.0  ;;  %v186_v35 = vand.u32 127, %v58_v32  ;;  %v494_v41 = vmov 0.0   ;;  %v15_v48 = vld [vmem:[%s657_s0] sm:$0xf] }
   0xe   :  { %v184_v34 = vadd.s32 8, %v59_v33  ;;  %v196_v36 = vmul.u32 8, %v59_v33  ;;  %v118_v44 = vsub.s32 1, %v59_v33  ;;  %v122_v45 = vsub.s32 3, %v59_v33  ;;  %s495_s0 = smov [#allocation3]  }
   0xf   :  { %102 = vadd.xlane.f32.xlu1 %v101_v14  ;;  %v195_v38 = vmul.u32 2, %v186_v35  ;;  %v60_v46 = vsub.s32 0, %v59_v33  ;;  %v64_v47 = vsub.s32 2, %v59_v33  ;;  %s357_s18 = sshll.u32 %s495_s0, 4  ;;  %s358_s18 = int_to_ptr.vmem [resolvable:$true] %s357_s18 }
  0x10   :  { %99 = vadd.xlane.f32.xlu0 %v98_v15  ;;  %v197_v37 = vmul.u32 8, %v184_v34  ;;  %v200_v39 = vadd.s32 8, %v196_v36  ;;  %v119_v49 = vrot.slane %v15_v48, %v118_v44  ;;  %v123_v50 = vrot.slane %v15_v48, %v122_v45  ;;  %s446_s19 = scalar_lea.vmem %s358_s18, 2048  ;;  %p451_p1 = scmp.lt.s32.totalorder %s358_s18, %s358_s18 }
  0x11   :  { %vm198_vm1 = vcmp.ge.s32.totalorder %v195_v38, %v196_v36  ;;  %v61_v51 = vrot.slane %v15_v48, %v60_v46  ;;  %v65_v52 = vrot.slane %v15_v48, %v64_v47  ;;  %p447_p0 = scmp.ne.s32.totalorder %s358_s18, %s446_s19  ;;  %p452_p2 = scmp.lt.s32.totalorder %s446_s19, %s446_s19 }
  0x12   :  { %v201_v40 = vadd.s32 8, %v197_v37  ;;  %vm199_vm2 = vcmp.ge.s32.totalorder %v195_v38, %v197_v37  ;;  %vm202_vm3 = vcmp.lt.s32.totalorder %v195_v38, %v200_v39  ;;  %v591_v53 = vrot.slane %v119_v49, %v118_v44 }
  0x13   :  { %49 = vadd.xlane.f32.xlu1 %v48_v18  ;;  %vm204_vm5 = vmand %vm198_vm1, %vm202_vm3  ;;  %v593_v54 = vrot.slane %v123_v50, %v118_v44  ;;  %v595_v55 = vrot.slane %v61_v51, %v60_v46  ;;  %v597_v56 = vrot.slane %v65_v52, %v60_v46  ;;  %p453_p3 = por %p452_p2, %p451_p1 }
  0x14   :  { %46 = vadd.xlane.f32.xlu0 %v45_v19  ;;  %vm203_vm4 = vcmp.lt.s32.totalorder %v195_v38, %v201_v40  ;;  %v384_v42 = vsel %vm204_vm5, 1.0, %v494_v41 }
  0x15   :  { %vm205_vm7 = vmand %vm199_vm2, %vm203_vm4  ;;  %414 = vmatprep.mubr.msk.f32.mxu0 %vm210_vm6, %v384_v42  ;;  %p454_p4 = pnand %p453_p3, %p447_p0 }
  0x16   :  { %v585_v43 = vsel %vm205_vm7, 1.0, %v494_v41 }
  0x17   :  { %108 = vadd.xlane.f32.xlu1 %v107_v22 }
  0x18   :  { %105 = vadd.xlane.f32.xlu0 %v104_v23 }
  0x1b   :  { %55 = vadd.xlane.f32.xlu1 %v54_v26 }
  0x1c   :  { %52 = vadd.xlane.f32.xlu0 %v51_v27 }
  0x1f   :  { %114 = vadd.xlane.f32.xlu1 %v113_v30 }
  0x20   :  { %111 = vadd.xlane.f32.xlu0 %v110_v31 }
  0x90   :  { %v94_v57 = vpop.xlane.xlu1 %93 }
  0x91   :  { %v35_v58 = vpop.xlane.xlu0 %34  ;;  %v134_v59 = vmul.f32 %v591_v53, %v94_v57  ;;  %v135_v60 = vmul.f32 %v593_v54, %v94_v57 }
  0x92   :  { %v76_v61 = vmul.f32 %v595_v55, %v35_v58  ;;  %v77_v62 = vmul.f32 %v597_v56, %v35_v58 }
  0x94   :  { %v150_v63 = vadd.f32 %v134_v59, %v76_v61  ;;  %v151_v0 = vadd.f32 %v135_v60, %v77_v62  ;;  %v97_v1 = vpop.xlane.xlu1 %96 }
  0x95   :  { %v38_v2 = vpop.xlane.xlu0 %37  ;;  %v136_v3 = vmul.f32 %v591_v53, %v97_v1  ;;  %v137_v4 = vmul.f32 %v593_v54, %v97_v1 }
  0x96   :  { %166 = vst [vmem:[#allocation3] sm:$0xff] %v150_v63  ;;  %167 = vst [vmem:[#allocation3 + $0x8] sm:$0xff] %v151_v0  ;;  %v78_v5 = vmul.f32 %v595_v55, %v38_v2  ;;  %v79_v6 = vmul.f32 %v597_v56, %v38_v2  ;;  %v187_v11 = vadd.f32 %v151_v0, %v150_v63 }
  0x98   :  { %v152_v7 = vadd.f32 %v136_v3, %v78_v5  ;;  %v153_v8 = vadd.f32 %v137_v4, %v79_v6  ;;  %v44_v9 = vpop.xlane.xlu1 %43 }
  0x99   :  { %v41_v10 = vpop.xlane.xlu0 %40  ;;  %v82_v13 = vmul.f32 %v595_v55, %v44_v9  ;;  %v83_v14 = vmul.f32 %v597_v56, %v44_v9 }
  0x9a   :  { %168 = vst [vmem:[#allocation3 + $0x10] sm:$0xff] %v152_v7  ;;  %169 = vst [vmem:[#allocation3 + $0x18] sm:$0xff] %v153_v8  ;;  %v188_v12 = vadd.f32 %v153_v8, %v152_v7  ;;  %v80_v15 = vmul.f32 %v595_v55, %v41_v10  ;;  %v81_v16 = vmul.f32 %v597_v56, %v41_v10 }
  0x9c   :  { %v103_v17 = vpop.xlane.xlu1 %102  ;;  %v417_v19 = vpack.c.bf16 %v188_v12, %v187_v11 }
  0x9d   :  { %v100_v18 = vpop.xlane.xlu0 %99  ;;  %v140_v20 = vmul.f32 %v591_v53, %v103_v17  ;;  %v141_v21 = vmul.f32 %v593_v54, %v103_v17 }
  0x9e   :  { %v138_v22 = vmul.f32 %v591_v53, %v100_v18  ;;  %v139_v23 = vmul.f32 %v593_v54, %v100_v18  ;;  %418 = vmatprep.subr.bf16.mxu0 %v417_v19 }
  0x9f   :  { %v156_v24 = vadd.f32 %v140_v20, %v82_v13  ;;  %v157_v25 = vadd.f32 %v141_v21, %v83_v14  ;;  %420 = vmatpush3.bf16.msra.mxu0 %v417_v19 }
  0xa0   :  { %v154_v26 = vadd.f32 %v138_v22, %v80_v15  ;;  %v155_v27 = vadd.f32 %v139_v23, %v81_v16  ;;  %v50_v28 = vpop.xlane.xlu1 %49 }
  0xa1   :  { %v47_v29 = vpop.xlane.xlu0 %46  ;;  %172 = vst [vmem:[#allocation3 + $0x30] sm:$0xff] %v156_v24  ;;  %173 = vst [vmem:[#allocation3 + $0x38] sm:$0xff] %v157_v25  ;;  %v190_v30 = vadd.f32 %v157_v25, %v156_v24  ;;  %v86_v33 = vmul.f32 %v595_v55, %v50_v28  ;;  %v87_v34 = vmul.f32 %v597_v56, %v50_v28 }
  0xa2   :  { %170 = vst [vmem:[#allocation3 + $0x20] sm:$0xff] %v154_v26  ;;  %171 = vst [vmem:[#allocation3 + $0x28] sm:$0xff] %v155_v27  ;;  %v189_v31 = vadd.f32 %v155_v27, %v154_v26  ;;  %v84_v35 = vmul.f32 %v595_v55, %v47_v29  ;;  %v85_v36 = vmul.f32 %v597_v56, %v47_v29 }
  0xa4   :  { %v421_v32 = vpack.c.bf16 %v190_v30, %v189_v31  ;;  %v109_v37 = vpop.xlane.xlu1 %108 }
  0xa5   :  { %v106_v38 = vpop.xlane.xlu0 %105  ;;  %v144_v39 = vmul.f32 %v591_v53, %v109_v37  ;;  %v145_v40 = vmul.f32 %v593_v54, %v109_v37 }
  0xa6   :  { %v142_v41 = vmul.f32 %v591_v53, %v106_v38  ;;  %v143_v42 = vmul.f32 %v593_v54, %v106_v38  ;;  %422 = vmatprep.subr.bf16.mxu0 %v421_v32 }
  0xa7   :  { %424 = vmatpush3.bf16.msra.mxu0 %v421_v32  ;;  %v160_v44 = vadd.f32 %v144_v39, %v86_v33  ;;  %v161_v45 = vadd.f32 %v145_v40, %v87_v34 }
  0xa8   :  { %v158_v46 = vadd.f32 %v142_v41, %v84_v35  ;;  %v159_v47 = vadd.f32 %v143_v42, %v85_v36  ;;  %v56_v48 = vpop.xlane.xlu1 %55 }
  0xa9   :  { %v53_v49 = vpop.xlane.xlu0 %52  ;;  %176 = vst [vmem:[#allocation3 + $0x50] sm:$0xff] %v160_v44  ;;  %177 = vst [vmem:[#allocation3 + $0x58] sm:$0xff] %v161_v45  ;;  %v192_v50 = vadd.f32 %v161_v45, %v160_v44  ;;  %v90_v57 = vmul.f32 %v595_v55, %v56_v48  ;;  %v91_v58 = vmul.f32 %v597_v56, %v56_v48 }
  0xaa   :  { %174 = vst [vmem:[#allocation3 + $0x40] sm:$0xff] %v158_v46  ;;  %175 = vst [vmem:[#allocation3 + $0x48] sm:$0xff] %v159_v47  ;;  %v191_v51 = vadd.f32 %v159_v47, %v158_v46  ;;  %v88_v59 = vmul.f32 %v595_v55, %v53_v49  ;;  %v89_v60 = vmul.f32 %v597_v56, %v53_v49 }
  0xac   :  { %v425_v52 = vpack.c.bf16 %v192_v50, %v191_v51  ;;  %v115_v61 = vpop.xlane.xlu1 %114 }
  0xad   :  { %v112_v62 = vpop.xlane.xlu0 %111  ;;  %v148_v63 = vmul.f32 %v591_v53, %v115_v61  ;;  %v149_v0 = vmul.f32 %v593_v54, %v115_v61 }
  0xae   :  { %v146_v1 = vmul.f32 %v591_v53, %v112_v62  ;;  %v147_v2 = vmul.f32 %v593_v54, %v112_v62  ;;  %426 = vmatprep.subr.bf16.mxu0 %v425_v52 }
  0xaf   :  { %428 = vmatpush3.bf16.msra.mxu0 %v425_v52  ;;  %v164_v3 = vadd.f32 %v148_v63, %v90_v57  ;;  %v165_v4 = vadd.f32 %v149_v0, %v91_v58 }
  0xb0   :  { %v162_v5 = vadd.f32 %v146_v1, %v88_v59  ;;  %v163_v6 = vadd.f32 %v147_v2, %v89_v60 }
  0xb1   :  { %180 = vst [vmem:[#allocation3 + $0x70] sm:$0xff] %v164_v3  ;;  %181 = vst [vmem:[#allocation3 + $0x78] sm:$0xff] %v165_v4  ;;  %v194_v55 = vadd.f32 %v165_v4, %v164_v3 }
  0xb2   :  { %178 = vst [vmem:[#allocation3 + $0x60] sm:$0xff] %v162_v5  ;;  %179 = vst [vmem:[#allocation3 + $0x68] sm:$0xff] %v163_v6  ;;  %v193_v56 = vadd.f32 %v163_v6, %v162_v5 }
  0xb4   :  { %v429_v7 = vpack.c.bf16 %v194_v55, %v193_v56 }
  0xb6   :  { %430 = vmatprep.subr.bf16.mxu0 %v429_v7 }
  0xb7   :  { %432 = vmatpush3.bf16.msra.mxu0 %v429_v7 }
  0xba   :  { %415 = vmatmul.mubr.msk.f32.vlgmr.msra.gmra.mrb[0].mxu0 %vm210_vm6, %v585_v43 }
 0x18d   :  { %v416_v53 = vpop.f32.mrb[0].mxu0 }
 0x18e   :  { %v283_v54 = vpop.f32.mrb[1].mxu0 }
 0x18f   :  { %v302_v8 = vadd.f32 %v416_v53, %v283_v54 }
 0x191   :  { %303 = vadd.xlane.f32.xlu0 %v302_v8 }
 0x192   :  { %457 = shalt.err (!%p454_p4)
}
 0x193   :  { %s458_s22 = scalar_lea.hbm %s659_s2, 2048 }
 0x194   :  { %p459_p5 = scmp.ne.s32.totalorder %s659_s2, %s458_s22  ;;  %p462_p6 = scmp.lt.u32.totalorder %s458_s22, %s659_s2 }
 0x196   :  { %p464_p7 = pnand %p462_p6, %p459_p5 }
 0x198   :  { %467 = shalt.err (!%p464_p7)
}
 0x199   :  { %s496_s27 = smov 256   ;;  %s497_s28 = smov 16  }
 0x19a   :  { %363 = dma.vmem_to_hbm [thread:$0]  %s358_s18, 2048, %s659_s2, [#allocation4], %s496_s27, %s496_s27, %s497_s28  }
 0x19b   :  { %s498_s2 = smov [#allocation5]  }
 0x19c   :  { %s369_s6 = sshll.u32 %s498_s2, 4  ;;  %s370_s6 = int_to_ptr.vmem [resolvable:$true] %s369_s6 }
 0x19d   :  { %s468_s7 = scalar_lea.vmem %s370_s6, 256  ;;  %p473_p9 = scmp.lt.s32.totalorder %s370_s6, %s370_s6 }
 0x19e   :  { %p469_p8 = scmp.ne.s32.totalorder %s370_s6, %s468_s7  ;;  %p474_p10 = scmp.lt.s32.totalorder %s468_s7, %s468_s7 }
 0x1a0   :  { %p475_p11 = por %p474_p10, %p473_p9 }
 0x1a2   :  { %p476_p12 = pnand %p475_p11, %p469_p8 }
 0x21e   :  { %v304_v43 = vpop.xlane.xlu0 %303 }
 0x21f   :  { %v305_v9 = vrot.slane %v304_v43, 4 }
 0x221   :  { %v306_v10 = vadd.f32 %v305_v9, %v304_v43 }
 0x223   :  { %v307_v11 = vrot.slane %v306_v10, 2 }
 0x225   :  { %v308_v12 = vadd.f32 %v307_v11, %v306_v10 }
 0x227   :  { %v309_v13 = vrot.slane %v308_v12, 1 }
 0x229   :  { %v310_v14 = vadd.f32 %v309_v13, %v308_v12 }
 0x22b   :  { %433 = vpush %v310_v14 }
 0x25c   :  { %s434_s4 = spop %433 }
 0x25d   :  { %s314_s5 = smul.f32 0.00048828125, %s434_s4 }
 0x25f   :  { %v315_v15 = vstv %s314_s5 }
 0x260   :  { %vm316_vm8 = vcmp.gt.f32.partialorder %v283_v54, %v315_v15  ;;  %vm317_vm9 = vcmp.gt.f32.partialorder %v416_v53, %v315_v15 }
 0x261   :  { %v318_v16 = vsel %vm316_vm8, %v283_v54, 0.0  ;;  %v319_v17 = vsel %vm317_vm9, %v416_v53, 0.0 }
 0x262   :  { %v320_v18 = vrot.slane %v318_v16, 4  ;;  %v336_v19 = vrot.slane %v319_v17, 4 }
 0x264   :  { %v321_v20 = vmin.f32 %v318_v16, %v320_v18  ;;  %v337_v21 = vmin.f32 %v319_v17, %v336_v19 }
 0x266   :  { %v322_v22 = vrot.slane %v321_v20, 2  ;;  %v338_v23 = vrot.slane %v337_v21, 2 }
 0x268   :  { %v323_v24 = vmin.f32 %v321_v20, %v322_v22  ;;  %v339_v25 = vmin.f32 %v337_v21, %v338_v23 }
 0x26a   :  { %v324_v26 = vrot.slane %v323_v24, 1  ;;  %v340_v27 = vrot.slane %v339_v25, 1 }
 0x26c   :  { %v325_v28 = vmin.f32 %v323_v24, %v324_v26  ;;  %v341_v29 = vmin.f32 %v339_v25, %v340_v27 }
 0x26e   :  { %v326_v30 = vsub.f32 %v318_v16, %v325_v28  ;;  %v342_v31 = vsub.f32 %v319_v17, %v341_v29 }
 0x270   :  { %v327_v32 = vrot.slane %v326_v30, 4  ;;  %v343_v33 = vrot.slane %v342_v31, 4 }
 0x272   :  { %v328_v34 = vmax.f32 %v326_v30, %v327_v32  ;;  %v344_v35 = vmax.f32 %v342_v31, %v343_v33 }
 0x274   :  { %v329_v36 = vrot.slane %v328_v34, 2  ;;  %v345_v37 = vrot.slane %v344_v35, 2 }
 0x276   :  { %v330_v38 = vmax.f32 %v328_v34, %v329_v36  ;;  %v346_v39 = vmax.f32 %v344_v35, %v345_v37 }
 0x278   :  { %v331_v40 = vrot.slane %v330_v38, 1  ;;  %v347_v41 = vrot.slane %v346_v39, 1 }
 0x27a   :  { %v332_v42 = vmax.f32 %v330_v38, %v331_v40  ;;  %v348_v44 = vmax.f32 %v346_v39, %v347_v41 }
 0x27c   :  { %442 = vrcp.f32 %v332_v42 }
 0x27d   :  { %444 = vrcp.f32 %v348_v44 }
 0x286   :  { %v443_v45 = vpop.eup %442 }
 0x287   :  { %v445_v46 = vpop.eup %444  ;;  %v334_v47 = vmul.f32 %v443_v45, %v326_v30 }
 0x288   :  { %v350_v48 = vmul.f32 %v445_v46, %v342_v31 }
 0x289   :  { %335 = vst [vmem:[#allocation5] sm:$0xff] %v334_v47 }
 0x28a   :  { %351 = vst [vmem:[#allocation5 + $0x8] sm:$0xff] %v350_v48 }
 0x28b   :  { %479 = shalt.err (!%p476_p12)
}
 0x28c   :  { %s480_s10 = scalar_lea.hbm %s660_s3, 256 }
 0x28d   :  { %p481_p13 = scmp.ne.s32.totalorder %s660_s3, %s480_s10  ;;  %p484_p0 = scmp.lt.u32.totalorder %s480_s10, %s660_s3 }
 0x28f   :  { %p486_p1 = pnand %p484_p0, %p481_p13 }
 0x291   :  { %489 = shalt.err (!%p486_p1)
}
 0x292   :  { %s499_s15 = smov 128   ;;  %s500_s16 = smov 8  }
 0x293   :  { %375 = dma.vmem_to_hbm [thread:$0]  %s370_s6, 256, %s660_s3, [#allocation6], %s499_s15, %s499_s15, %s500_s16  }
 0x294   :  { %490 = dma.done.wait [#allocation4], 2048  }
 0x295   :  { %491 = vsyncadd [#allocation4], 4294965248 }
 0x296   :  { %492 = dma.done.wait [#allocation6], 256  }
 0x297   :  { %493 = vsyncadd [#allocation6], 4294967040 }
 0x298   :  { %382 = vsyncpa [#allocation4], 1 }
 0x299   :  { %383 = vsyncpa [#allocation6], 1 }

</bundles_post_ra>
